<compile_context>
chip_gen: v5e
topology: v5e:2x2
jax: 0.10.0
libtpu: 0.0.40
codegen_flags: <defaults>
</compile_context>

<pallas_src>
import functools

import jax
import jax.numpy as jnp
from jax.experimental import pallas as pl
from jax.experimental.pallas import tpu as pltpu


def _stdp_kernel(in_spike_ref, out_spike_t_ref, trace_pre_ref,
                 new_trace_ref, dw_ref, acc_ref, *, decay, scale):
    """One (cout, cin, n) grid step.

    in_spike_ref / trace_pre_ref / new_trace_ref : (tile_n,   tile_cin)  f32
    out_spike_t_ref                              : (tile_cout, tile_n)   f32
    dw_ref / acc_ref                             : (tile_cout, tile_cin) f32
    Grid = (cout, cin, n); n (batch == contraction axis) is innermost and is
    accumulated into acc_ref (init at n==0, scale+writeback at n==last).
    """
    n = pl.program_id(2)

    @pl.when(n == 0)
    def _init():
        acc_ref[...] = jnp.zeros_like(acc_ref)

    # Trace update: single multiply-add with the precomputed decay constant.
    # Kept in f32 on the VPU so the stored trace stays exact (v5e-safe).
    trace = trace_pre_ref[...] * decay + in_spike_ref[...]
    new_trace_ref[...] = trace

    # dw tile = out_spike^T @ trace (contraction over the batch axis).
    # LHS already arrives as (M, K) = [tile_cout, tile_n]; both MXU operands
    # are bf16 (out_spike is 0/1 -> exact), accumulation stays f32.
    acc_ref[...] += jnp.dot(out_spike_t_ref[...].astype(jnp.bfloat16),
                            trace.astype(jnp.bfloat16),
                            preferred_element_type=jnp.float32)

    @pl.when(n == pl.num_programs(2) - 1)
    def _finalize():
        acc = acc_ref[...]
        if scale != 1.0:
            acc = acc * scale           # scale once, on the f32 accumulator
        dw_ref[...] = acc


@functools.partial(
    jax.jit,
    static_argnames=("tau_pre", "scale", "tile_n", "tile_cin", "tile_cout"),
    donate_argnums=(2,),  # trace_pre is updated in place when aliasing is on
)
def stdp_single_step(in_spike, out_spike, trace_pre, *, tau_pre, scale=1.0,
                     tile_n=None, tile_cin=None, tile_cout=None):
    """One STDP step: returns (new_trace_pre, delta_w)."""
    N, C_in = in_spike.shape
    N2, C_out = out_spike.shape
    assert N2 == N and trace_pre.shape == (N, C_in)

    # ---- tile selection (sized for v7x: 32 MiB scoped of 64 MiB physical,
    #      remembering BlockSpec double-buffers every operand) ----------------
    if tile_n is None:
        tile_n = N if N <= 512 else 512
    if tile_cin is None:
        tile_cin = C_in if C_in <= 1024 else 1024
    if tile_cout is None:
        tile_cout = C_out if C_out <= 256 else 256
    assert N % tile_n == 0 and C_in % tile_cin == 0 and C_out % tile_cout == 0
    # (8, 128) layout legality whenever a dim is tiled below its full extent.
    if tile_n < N:
        assert tile_n % 128 == 0      # lane dim of the transposed out_spike
    if tile_cin < C_in:
        assert tile_cin % 128 == 0    # lane dim of in_spike / trace / dw
    if tile_cout < C_out:
        assert tile_cout % 8 == 0     # sublane dim of dw / out_spike^T

    grid = (C_out // tile_cout, C_in // tile_cin, N // tile_n)

    # One-time layout change outside the kernel: present out_spike as
    # [C_out, N] so the MXU LHS is (M, K) and no XLU transpose is emitted.
    out_spike_t = out_spike.T

    kernel = functools.partial(
        _stdp_kernel, decay=1.0 - 1.0 / float(tau_pre), scale=float(scale))

    # In-place trace update is only safe when every (n, cin) trace block is
    # read exactly once, i.e. C_out fits a single cout tile (otherwise the
    # re-read on the next cout tile would see the already-updated trace).
    io_aliases = {2: 0} if grid[0] == 1 else {}

    new_trace, dw = pl.pallas_call(
        kernel,
        out_shape=(
            jax.ShapeDtypeStruct((N, C_in), jnp.float32),
            jax.ShapeDtypeStruct((C_out, C_in), jnp.float32),
        ),
        grid_spec=pltpu.PrefetchScalarGridSpec(
            num_scalar_prefetch=0,
            grid=grid,
            in_specs=[
                pl.BlockSpec((tile_n, tile_cin), lambda co, ci, n: (n, ci)),
                pl.BlockSpec((tile_cout, tile_n), lambda co, ci, n: (co, n)),
                pl.BlockSpec((tile_n, tile_cin), lambda co, ci, n: (n, ci)),
            ],
            out_specs=(
                pl.BlockSpec((tile_n, tile_cin), lambda co, ci, n: (n, ci)),
                pl.BlockSpec((tile_cout, tile_cin), lambda co, ci, n: (co, ci)),
            ),
            scratch_shapes=[pltpu.VMEM((tile_cout, tile_cin), jnp.float32)],
        ),
        input_output_aliases=io_aliases,
        compiler_params=pltpu.CompilerParams(
            # cin is the wide, truly independent axis -> parallel (sharded
            # across TensorCores on v7x).  cout redundantly recomputes the
            # trace, so keep it "arbitrary"; n is the reduction -> arbitrary.
            dimension_semantics=("arbitrary", "parallel", "arbitrary"),
            vmem_limit_bytes=32 * 1024 * 1024,
        ),
    )(in_spike, out_spike_t, trace_pre)
    return new_trace, dw


class STDPState:
    """Mirrors the PyTorch STDP module's forward() semantics in JAX.

    Faithful to the reference: trace_post / tau_post are carried but never
    updated, and forward() returns after consuming only the FIRST recorded
    (in_spike, out_spike) pair (the `return` sits inside the loop).
    """

    def __init__(self, c_in, c_out, tau_pre, tau_post):
        self.tau_pre = tau_pre
        self.tau_post = tau_post
        self.trace_pre = None
        self.trace_post = None
        # nn.Linear synapse weight (unused by forward(); kept for fidelity).
        self.synapse_weight = (
            jax.random.normal(jax.random.PRNGKey(42), (c_out, c_in), jnp.float32)
            * 0.01)

    def forward(self, in_records, out_records, scale=1.0, **tile_kwargs):
        if len(in_records) == 0:
            return None
        in_spike = in_records.pop(0)
        out_spike = out_records.pop(0)
        N, C_in = in_spike.shape
        trace_pre = self.trace_pre
        if trace_pre is None:
            trace_pre = jnp.zeros((N, C_in), jnp.float32)
        new_trace, dw = stdp_single_step(
            in_spike, out_spike, trace_pre,
            tau_pre=self.tau_pre, scale=scale, **tile_kwargs)
        self.trace_pre = new_trace
        if self.trace_post is None:
            self.trace_post = 0.0  # trace_post is never updated in the reference
        return dw


if __name__ == "__main__":
    N, C_IN, C_OUT, T = 256, 256, 32, 3
    TAU_PRE, TAU_POST, SCALE = 2.0, 2.0, 0.5

    key = jax.random.PRNGKey(0)
    keys = jax.random.split(key, 2 * T)
    # Binary spike trains, like SNN monitors would record.
    in_records = [
        (jax.random.uniform(keys[2 * t], (N, C_IN)) < 0.3).astype(jnp.float32)
        for t in range(T)
    ]
    out_records = [
        (jax.random.uniform(keys[2 * t + 1], (N, C_OUT)) < 0.3).astype(jnp.float32)
        for t in range(T)
    ]
    in_ref0, out_ref0 = in_records[0], out_records[0]

    stdp = STDPState(C_IN, C_OUT, TAU_PRE, TAU_POST)
    # Tiles chosen to exercise the grid: 1 cout tile x 2 cin tiles x 2 n-steps
    # (cin parallel axis + n-reduction accumulator + in-place trace aliasing).
    delta_w = stdp.forward(in_records, out_records, scale=SCALE,
                           tile_n=128, tile_cin=128, tile_cout=32)
    delta_w = jax.block_until_ready(delta_w)
    new_trace = jax.block_until_ready(stdp.trace_pre)

    # Pure-JAX f32 reference of the exact PyTorch math.
    decay = 1.0 - 1.0 / TAU_PRE
    trace0 = jnp.zeros((N, C_IN), jnp.float32)
    trace_ref = trace0 * decay + in_ref0
    dw_ref = (trace_ref[:, None, :] * out_ref0[:, :, None]).sum(0) * SCALE

    assert delta_w.shape == (C_OUT, C_IN)
    assert new_trace.shape == (N, C_IN)
    # 0/1 spikes, zero initial trace and f32-accumulator scaling make the bf16
    # MXU operands exact at these demo sizes.
    assert jnp.allclose(delta_w, dw_ref, atol=1e-4, rtol=1e-4)
    assert jnp.allclose(new_trace, trace_ref, atol=1e-6, rtol=1e-6)
    print("KERNEL_OK")
</pallas_src>

<mosaic_0001>
module attributes {stable_mosaic.version = 11 : i64} {
  func.func @_stdp_kernel(%arg0: i32, %arg1: i32, %arg2: i32, %arg3: memref<128x128xf32, #tpu.memory_space<vmem>>, %arg4: memref<32x128xf32, #tpu.memory_space<vmem>>, %arg5: memref<128x128xf32, #tpu.memory_space<vmem>>, %arg6: memref<128x128xf32, #tpu.memory_space<vmem>>, %arg7: memref<32x128xf32, #tpu.memory_space<vmem>>, %arg8: memref<32x128xf32, #tpu.memory_space<vmem>>) attributes {dimension_semantics = [#tpu.dimension_semantics<arbitrary>, #tpu.dimension_semantics<parallel>, #tpu.dimension_semantics<arbitrary>], iteration_bounds = array<i64: 1, 2, 2>, scalar_prefetch = 0 : i64, scratch_operands = 1 : i64, tpu.core_type = #tpu.core_type<tc>, window_params = [{transform_indices = @transform_0, window_bounds = array<i64: 128, 128>}, {transform_indices = @transform_1, window_bounds = array<i64: 32, 128>}, {transform_indices = @transform_2, window_bounds = array<i64: 128, 128>}, {transform_indices = @transform_3, window_bounds = array<i64: 128, 128>}, {transform_indices = @transform_4, window_bounds = array<i64: 32, 128>}]} {
    %c0_i32 = arith.constant 0 : i32
    %0 = arith.cmpi eq, %arg2, %c0_i32 : i32
    %1 = arith.extui %0 : i1 to i32
    %c0_i32_0 = arith.constant 0 : i32
    %2 = arith.cmpi ne, %1, %c0_i32_0 : i32
    scf.if %2 {
      %cst_14 = arith.constant 0.000000e+00 : f32
      %19 = vector.broadcast %cst_14 : f32 to vector<32x128xf32>
      %c0_15 = arith.constant 0 : index
      %c0_16 = arith.constant 0 : index
      %20 = vector.load %arg8[%c0_15, %c0_16] : memref<32x128xf32, #tpu.memory_space<vmem>>, vector<32x128xf32>
      tpu.vector_store %arg8[%c0_15, %c0_16], %19 {strides = array<i32>} : memref<32x128xf32, #tpu.memory_space<vmem>>, vector<32x128xf32>,
    } else {
    }
    %c0 = arith.constant 0 : index
    %c0_1 = arith.constant 0 : index
    %3 = vector.load %arg5[%c0, %c0_1] : memref<128x128xf32, #tpu.memory_space<vmem>>, vector<128x128xf32>
    %cst = arith.constant 5.000000e-01 : f32
    %4 = vector.broadcast %cst : f32 to vector<128x128xf32>
    %5 = arith.mulf %3, %4 : vector<128x128xf32>
    %c0_2 = arith.constant 0 : index
    %c0_3 = arith.constant 0 : index
    %6 = vector.load %arg3[%c0_2, %c0_3] : memref<128x128xf32, #tpu.memory_space<vmem>>, vector<128x128xf32>
    %7 = arith.addf %5, %6 : vector<128x128xf32>
    %c0_4 = arith.constant 0 : index
    %c0_5 = arith.constant 0 : index
    %8 = vector.load %arg6[%c0_4, %c0_5] : memref<128x128xf32, #tpu.memory_space<vmem>>, vector<128x128xf32>
    tpu.vector_store %arg6[%c0_4, %c0_5], %7 {strides = array<i32>} : memref<128x128xf32, #tpu.memory_space<vmem>>, vector<128x128xf32>,
    %c0_6 = arith.constant 0 : index
    %c0_7 = arith.constant 0 : index
    %9 = vector.load %arg8[%c0_6, %c0_7] : memref<32x128xf32, #tpu.memory_space<vmem>>, vector<32x128xf32>
    %c0_8 = arith.constant 0 : index
    %c0_9 = arith.constant 0 : index
    %10 = vector.load %arg4[%c0_8, %c0_9] : memref<32x128xf32, #tpu.memory_space<vmem>>, vector<32x128xf32>
    %11 = arith.truncf %10 : vector<32x128xf32> to vector<32x128xbf16>
    %12 = arith.truncf %7 : vector<128x128xf32> to vector<128x128xbf16>
    %cst_10 = arith.constant dense<0.000000e+00> : vector<32x128xf32>
    %13 = tpu.matmul %11, %12, %cst_10 {dimension_numbers = #tpu.dot_dimension_numbers<[1], [0], [0], [1], [0, 0, 1, 1], [], []>} : vector<32x128xbf16>, vector<128x128xbf16>, vector<32x128xf32> -> vector<32x128xf32>
    %14 = arith.addf %9, %13 : vector<32x128xf32>
    %c0_11 = arith.constant 0 : index
    %c0_12 = arith.constant 0 : index
    %15 = vector.load %arg8[%c0_11, %c0_12] : memref<32x128xf32, #tpu.memory_space<vmem>>, vector<32x128xf32>
    tpu.vector_store %arg8[%c0_11, %c0_12], %14 {strides = array<i32>} : memref<32x128xf32, #tpu.memory_space<vmem>>, vector<32x128xf32>,
    %c1_i32 = arith.constant 1 : i32
    %16 = arith.cmpi eq, %arg2, %c1_i32 : i32
    %17 = arith.extui %16 : i1 to i32
    %c0_i32_13 = arith.constant 0 : i32
    %18 = arith.cmpi ne, %17, %c0_i32_13 : i32
    scf.if %18 {
      %c0_14 = arith.constant 0 : index
      %c0_15 = arith.constant 0 : index
      %19 = vector.load %arg8[%c0_14, %c0_15] : memref<32x128xf32, #tpu.memory_space<vmem>>, vector<32x128xf32>
      %cst_16 = arith.constant 5.000000e-01 : f32
      %20 = vector.broadcast %cst_16 : f32 to vector<32x128xf32>
      %21 = arith.mulf %19, %20 : vector<32x128xf32>
      %c0_17 = arith.constant 0 : index
      %c0_18 = arith.constant 0 : index
      %22 = vector.load %arg7[%c0_17, %c0_18] : memref<32x128xf32, #tpu.memory_space<vmem>>, vector<32x128xf32>
      tpu.vector_store %arg7[%c0_17, %c0_18], %21 {strides = array<i32>} : memref<32x128xf32, #tpu.memory_space<vmem>>, vector<32x128xf32>,
    } else {
    }
    return
  }
  func.func @transform_0(%arg0: i32, %arg1: i32, %arg2: i32) -> (i32, i32) {
    %c0_i32 = arith.constant 0 : i32
    return %arg2, %arg1 : i32, i32
  }
  func.func @transform_1(%arg0: i32, %arg1: i32, %arg2: i32) -> (i32, i32) {
    %c0_i32 = arith.constant 0 : i32
    return %arg0, %arg2 : i32, i32
  }
  func.func @transform_2(%arg0: i32, %arg1: i32, %arg2: i32) -> (i32, i32) {
    %c0_i32 = arith.constant 0 : i32
    return %arg2, %arg1 : i32, i32
  }
  func.func @transform_3(%arg0: i32, %arg1: i32, %arg2: i32) -> (i32, i32) {
    %c0_i32 = arith.constant 0 : i32
    return %arg2, %arg1 : i32, i32
  }
  func.func @transform_4(%arg0: i32, %arg1: i32, %arg2: i32) -> (i32, i32) {
    %c0_i32 = arith.constant 0 : i32
    return %arg0, %arg1 : i32, i32
  }
}

</mosaic_0001>

<bundles_post_ra>
// kernel: stdp_single_step.1
= control target key start
LH: loop header
LB: loop body
LE: loop exit
PB: predicated region body
PF: predicated region fallthrough
CT: control target
= control target key end

     0   :  { %s1602_s0 = inlined_call_operand.hbm [shape: f32[256,256], index: 0, kind: input, shape index: {}]   ;;  %s1603_s1 = inlined_call_operand.hbm [shape: f32[32,256], index: 1, kind: input, shape index: {}]   ;;  %s1604_s2 = inlined_call_operand.hbm [shape: f32[256,256], index: 2, kind: input, shape index: {}, may-alias: {2,3}]   ;;  %s1605_s3 = inlined_call_operand.hbm [shape: f32[256,256], index: 3, kind: output, shape index: {0}, may-alias: {2,3}]   ;;  %s1606_s4 = inlined_call_operand.hbm [shape: f32[32,256], index: 4, kind: output, shape index: {1}]  }
   0x1   :  { %1631 = sst [smem:[#allocation34_spill]] %s1603_s1 }
   0x2   :  { %1632 = sst [smem:[#allocation35_spill]] %s1605_s3 }
   0x3   :  { %1633 = sst [smem:[#allocation36_spill]] %s1606_s4 }
   0x4   :  { %10 = vsyncpa [#allocation4], 0 }
   0x5   :  { %12 = vsyncpa [#allocation4 + $0x1], 0 }
   0x6   :  { %13 = vsyncpa [#allocation7], 0 }
   0x7   :  { %15 = vsyncpa [#allocation7 + $0x1], 0 }
   0x8   :  { %16 = vsyncpa [#allocation5], 0 }
   0x9   :  { %18 = vsyncpa [#allocation5 + $0x1], 0 }
   0xa   :  { %19 = vsyncpa [#allocation11], 0 }
   0xb   :  { %21 = vsyncpa [#allocation11 + $0x1], 0  ;;  %s1213_s15 = smov 0   ;;  %s1215_s16 = smov 0  }
   0xc   :  { %s1217_s17 = smov 0   ;;  %s1219_s18 = smov 0  }
   0xd   :  { %s1221_s19 = smov 0   ;;  %s1223_s20 = smov 0  }
   0xe   :  { %s1225_s21 = smov 0   ;;  %s1227_s22 = smov 0  }
   0xf   :  { %s1229_s23 = smov 0   ;;  %s1231_s24 = smov 0  }
  0x10   :  { %s1233_s25 = smov 0   ;;  %s1235_s26 = smov 0  }
  0x11   :  { %s1237_s27 = smov 0   ;;  %s1239_s28 = smov 0  }
  0x12 LB: > { %1634 = sst [smem:[#allocation17_spill]] %s1127_s15  ;;  %s1282_s29 = sadd.s32 4294967295, %s1179_s28   ;;  %s1179_s28 = sphi %s1239_s28, %s27_s28   ;;  %s1175_s27 = sphi %s1237_s27, %s1699_s27   ;;  %s1171_s26 = sphi %s1235_s26, %s1698_s26   ;;  %s1167_s25 = sphi %s1233_s25, %s1688_s25   ;;  %s1163_s24 = sphi %s1231_s24, %s1697_s24   ;;  %s1159_s23 = sphi %s1229_s23, %s1686_s23   ;;  %s1155_s22 = sphi %s1227_s22, %s1696_s22   ;;  %s1151_s21 = sphi %s1225_s21, %s1695_s21   ;;  %s1147_s20 = sphi %s1223_s20, %s1684_s20   ;;  %s1143_s19 = sphi %s1221_s19, %s1694_s19   ;;  %s1139_s18 = sphi %s1219_s18, %s1693_s18   ;;  %s1135_s17 = sphi %s1217_s17, %s1682_s17   ;;  %s1131_s16 = sphi %s1215_s16, %s1692_s16   ;;  %s1127_s15 = sphi %s1213_s15, %s1691_s15  }
  0x13   : > { %1635 = sst [smem:[#allocation18_spill]] %s1135_s17  ;;  %s39_s30 = sadd.s32 1, %s1171_s26 }
  0x14   : > { %1636 = sst [smem:[#allocation19_spill]] %s1147_s20  ;;  %p1285_p0 = scmp.ge.s32.totalorder %s39_s30, 2 }
  0x15   : > { %1637 = sst [smem:[#allocation20_spill]] %s1151_s21  ;;  %p63_p1 = scmp.eq.s32.totalorder %s1179_s28, 0 }
  0x16   : > { %1638 = sst [smem:[#allocation21_spill]] %s1159_s23  ;;  %p69_p2 = scmp.eq.s32.totalorder %s1282_s29, 0 }
  0x17   : > { %1639 = sst [smem:[#allocation22_spill]] %s1163_s24  ;;  %s83_s6 = sadd.s32 1, %s1147_s20 }
  0x18   : > { %1640 = sst [smem:[#allocation23_spill]] %s1167_s25  ;;  %s1701_s30 = smov (%p1285_p0, %s39_s30), 0 }
  0x19   : > { %1641 = sst [smem:[#allocation24_spill]] %s1171_s26  ;;  %p90_p3 = scmp.ne.s32.totalorder %s1147_s20, %s1143_s19 }
  0x1a   : > { %1642 = sst [smem:[#allocation25_spill]] %s1175_s27  ;;  %p96_p4 = scmp.ne.s32.totalorder %s1143_s19, %s1139_s18 }
  0x1b   : > { %1644 = sst [smem:[#allocation26_spill]] %s1701_s30  ;;  %s1301_s7 = ssub.s32 %s1171_s26, %s1701_s30 }
  0x1c   : > { %p81_p5 = scmp.eq.s32.totalorder %s1301_s7, 0  ;;  %p1306_p6 = por %p90_p3, %p63_p1 }
  0x1d   : > { %p1312_p7 = por %p96_p4, %p69_p2  ;;  %p1615_p8 = scmp.lt.s32.totalorder %s1179_s28, 4 }
  0x1e   : > { %s1318_s10 = scalar_select %p81_p5, %s1147_s20, %s83_s6  }
  0x1f   : > { %s228_s11 = sand.u32 1, %s1179_s28   ;;  %s230_s12 = sand.u32 1, %s1147_s20  }
  0x20   : > { %1647 = sst [smem:[#allocation27_spill]] %s1318_s10  ;;  %s722_s13 = sshll.u32 %s230_s12, 5 }
  0x21   : > { %s723_s14 = sshll.u32 %s1171_s26, 3  ;;  %s1648_s1 = sld [smem:[#allocation34_spill]] }
  0x22   : > { %s232_s25 = scalar_lea.vmem [#allocation6], %s722_s13  ;;  %p769_p9 = pnand %p1615_p8, %p1306_p6 }
  0x23   : > { %s242_s24 = sshll.u32 %s232_s25, 4  ;;  %p728_p10 = scmp.ge.s32.totalorder %s1179_s28, 1  ;;  %s243_s24 = int_to_ptr.vmem [resolvable:$true] %s242_s24 }
  0x24   : > { %p274_p11 = scmp.lt.s32.totalorder %s1179_s28, 5  ;;  %s1611_s30 = smov 256  }
  0x25   : > { %s1613_s25 = smov 128   ;;  %s1616_s6 = smov 8  }
  0x26   : > { %p1338_p12 = pnand %p728_p10, %p274_p11  ;;  %s715_s12 = sadd.s32 4294967294, %s1179_s28  }
  0x27   : > { %s239_s4 = scalar_lea.hbm %s1648_s1, %s723_s14  ;;  %s42_s13 = sadd.s32 1, %s1175_s27 }
  0x28   : > { %s240_s3 = sshll.u32 %s239_s4, 4  ;;  %s1332_s4 = scalar_lea.sflag [#allocation7], %s228_s11  ;;  %s241_s3 = int_to_ptr.hbm [resolvable:$true] %s240_s3 }
  0x29   : > { %771 = dma.hbm_to_vmem [thread:$0]  (!%p769_p9), %s241_s3, 512, %s243_s24, %s1332_s4, %s1611_s30, %s1613_s25, %s1616_s6  }
  0x2a   : > { %s55_s11 = sadd.s32 1, %s1159_s23  ;;  %s1703_s13 = smov (!%p1285_p0, %s42_s13), %s1175_s27 }
  0x2b   : > { %p62_p13 = scmp.ne.s32.totalorder %s1159_s23, %s1155_s22  ;;  %p68_p3 = scmp.ne.s32.totalorder %s1155_s22, %s1151_s21 }
  0x2c   : > { %p44_p4 = scmp.ge.s32.totalorder %s1703_s13, 2  ;;  %p150_p5 = scmp.eq.s32.totalorder %s1282_s29, 3 }
  0x2d   : > { %p1355_p6 = por %p63_p1, %p62_p13  ;;  %p1361_p9 = por %p69_p2, %p68_p3 }
  0x2e   : > { %s1705_s13 = smov (%p44_p4, %s1703_s13), 0  ;;  %p1369_p0 = por %p150_p5, %p62_p13 }
  0x2f   : > { %1652 = sst [smem:[#allocation28_spill]] %s1705_s13  ;;  %p156_p10 = scmp.eq.s32.totalorder %s715_s12, 3 }
  0x30   : > { %s1653_s5 = scalar_select %p1369_p0, 1, 0 }
  0x31   : > { %s51_s14 = ssub.s32 %s1175_s27, %s1705_s13  ;;  %s167_s18 = sadd.s32 1, %s1135_s17 }
  0x32   : > { %s52_s30 = sor.u32 %s51_s14, %s1301_s7  ;;  %p1377_p1 = por %p156_p10, %p68_p3 }
  0x33   : > { %p53_p2 = scmp.eq.s32.totalorder %s52_s30, 0  ;;  %p165_p11 = scmp.eq.s32.totalorder %s51_s14, 0 }
  0x34   : > { %s1654_s25 = scalar_select %p1377_p1, 1, 0 }
  0x35   : > { %p177_p4 = scmp.ne.s32.totalorder %s1135_s17, %s1131_s16  ;;  %p183_p8 = scmp.ne.s32.totalorder %s1131_s16, %s1127_s15 }
  0x36   : > { %1655 = sst [smem:[#allocation29_spill]] %s1654_s25  ;;  %s204_s13 = sand.u32 1, %s1159_s23  }
  0x37   : > { %s1386_s6 = scalar_select %p53_p2, %s1159_s23, %s55_s11  }
  0x38   : > { %s1389_s1 = scalar_select %p165_p11, %s1135_s17, %s167_s18  }
  0x39   : > { %1656 = sst [smem:[#allocation30_spill]] %s1386_s6  ;;  %p1393_p13 = por %p177_p4, %p150_p5 }
  0x3a   : > { %1657 = sst [smem:[#allocation31_spill]] %s1389_s1  ;;  %p1397_p0 = por %p183_p8, %p156_p10 }
  0x3b   : > { %s1658_s12 = scalar_select %p1393_p13, 1, 0 }
  0x3c   : > { %s1660_s7 = scalar_select %p1397_p0, 1, 0 }
  0x3d   : > { %1659 = sst [smem:[#allocation32_spill]] %s1658_s12  ;;  %s744_s30 = sshll.u32 %s1171_s26, 5 }
  0x3e   : > { %1661 = sst [smem:[#allocation33_spill]] %s1660_s7  ;;  %s718_s14 = sshll.u32 %s204_s13, 7 }
  0x3f   : > { %s213_s10 = sadd.s32 %s1175_s27, %s744_s30  ;;  %s208_s15 = scalar_lea.vmem [#allocation3], %s718_s14 }
  0x40   : > { %s721_s20 = sshll.u32 %s213_s10, 3  ;;  %s218_s11 = sshll.u32 %s208_s15, 4  ;;  %s219_s11 = int_to_ptr.vmem [resolvable:$true] %s218_s11 }
  0x41   : > { %s215_s1 = scalar_lea.hbm %s1602_s0, %s721_s20  ;;  %p1662_p3 = scmp.lt.s32.totalorder %s1179_s28, 4 }
  0x42   : > { %s216_s17 = sshll.u32 %s215_s1, 4  ;;  %s263_s26 = scalar_lea.hbm %s1604_s2, %s721_s20  ;;  %s217_s17 = int_to_ptr.hbm [resolvable:$true] %s216_s17 }
  0x43   : > { %p766_p8 = pnand %p1662_p3, %p1355_p6  ;;  %s205_s23 = scalar_lea.sflag [#allocation4], %s204_s13 }
  0x44   : > { %s1663_s30 = smov 8   ;;  %s1664_s10 = smov 128  }
  0x45   : > { %s1665_s27 = smov 256   ;;  %s264_s15 = sshll.u32 %s263_s26, 4  ;;  %s265_s15 = int_to_ptr.hbm [resolvable:$true] %s264_s15 }
  0x46   : > { %768 = dma.hbm_to_vmem [thread:$0]  (!%p766_p8), %s217_s17, 2048, %s219_s11, %s205_s23, %s1665_s27, %s1664_s10, %s1663_s30  }
  0x47   : > { %s256_s21 = scalar_lea.vmem [#allocation8], %s718_s14  ;;  %278 = sbr.rel (%p1338_p12) target bundleno = 333 (0x14d), region = 32 }
  0x48   : > { %s266_s12 = sshll.u32 %s256_s21, 4  ;;  %s1424_s1 = sand.u32 (!%p1338_p12), 1, %s1155_s22   ;;  %s267_s12 = int_to_ptr.vmem [resolvable:$true] %s266_s12 }
  0x49   : > { %774 = dma.hbm_to_vmem [thread:$0]  (!%p766_p8), %s265_s15, 2048, %s267_s12, %s1332_s4, %s1665_s27, %s1664_s10, %s1663_s30  }
  0x4a   : > { %s729_s20 = sshll.u32 (!%p1338_p12), %s1424_s1, 7  ;;  %s281_s17 = scalar_lea.sflag (!%p1338_p12), [#allocation4], %s1424_s1 }
  0x4b   : > { %s1428_s23 = scalar_lea.vmem (!%p1338_p12), [#allocation3], %s729_s20 }
  0x4c   : > { %1106 = dma.done.wait (%p1361_p9), %s281_s17, 2048  }
  0x4d   : > { %1108 = vsyncadd (%p1361_p9), %s281_s17, 4294965248  ;;  %s290_s21 = sand.u32 1, %s1282_s29   ;;  %s292_s26 = sand.u32 1, %s1143_s19  }
  0x4e   : > { %s730_s27 = sshll.u32 %s292_s26, 5  ;;  %s291_s4 = scalar_lea.sflag [#allocation7], %s290_s21 }
  0x4f   : > { %s1436_s25 = scalar_lea.vmem [#allocation6], %s730_s27 }
  0x50   : > { %1110 = dma.done.wait (%p1312_p7), %s291_s4, 512  }
  0x51   : > { %1112 = vsyncadd (%p1312_p7), %s291_s4, 4294966784  ;;  %s1442_s6 = scalar_lea.vmem [#allocation8], %s729_s20 }
  0x52   : > { %1114 = dma.done.wait (%p1361_p9), %s291_s4, 2048  }
  0x53   : > { %1116 = vsyncadd (%p1361_p9), %s291_s4, 4294965248  ;;  %s342_s29 = sand.u32 1, %s1131_s16   ;;  %s1451_s13 = scalar_lea.vmem [#allocation9], %s729_s20 }
  0x54   : > { %s733_s8 = sshll.u32 %s342_s29, 5  ;;  %s1666_s12 = sld [smem:[#allocation22_spill]] }
  0x55   : > { %s1453_s3 = scalar_lea.vmem [#allocation10], %s733_s8 }
  0x5a   : > { %p734_p12 = scmp.ne.s32.totalorder %s1666_s12, 0 }
  0x5c   : > { %353 = sbr.rel (%p734_p12) target bundleno = 102 (0x66), region = 48 }
  0x61   : > { %v1184_v0 = vmov 0.0  }
  0x62   : > { %354 = vst [vmem:[#allocation2 + $0x10] sm:$0xff] %v1184_v0 }
  0x63   : > { %355 = vst [vmem:[#allocation2] sm:$0xff] %v1184_v0 }
  0x64   : > { %356 = vst [vmem:[#allocation2 + $0x18] sm:$0xff] %v1184_v0 }
  0x65   : > { %357 = vst [vmem:[#allocation2 + $0x8] sm:$0xff] %v1184_v0 }
  0x66 PF: > { %v372_v1 = vld [vmem:[%s1442_s6 + $0x70] sm:$0xff]  ;;  %v373_v2 = vld [vmem:[%s1442_s6 + $0x78] sm:$0xff]  ;;  %v370_v7 = vld [vmem:[%s1442_s6 + $0x60] sm:$0xff]  ;;  %s1667_s9 = sld [smem:[#allocation22_spill]] }
  0x67   : > { %v404_v3 = vld [vmem:[%s1428_s23 + $0x70] sm:$0xff]  ;;  %v388_v4 = vmul.f32 0.5, %v372_v1  ;;  %v389_v5 = vmul.f32 0.5, %v373_v2  ;;  %v405_v6 = vld [vmem:[%s1428_s23 + $0x78] sm:$0xff]  ;;  %v371_v8 = vld [vmem:[%s1442_s6 + $0x68] sm:$0xff]  ;;  %v386_v9 = vmul.f32 0.5, %v370_v7 }
  0x68   : > { %v387_v10 = vmul.f32 0.5, %v371_v8  ;;  %v402_v11 = vld [vmem:[%s1428_s23 + $0x60] sm:$0xff]  ;;  %v403_v12 = vld [vmem:[%s1428_s23 + $0x68] sm:$0xff]  ;;  %v368_v13 = vld [vmem:[%s1442_s6 + $0x50] sm:$0xff] }
  0x69   : > { %v420_v14 = vadd.f32 %v404_v3, %v388_v4  ;;  %v421_v15 = vadd.f32 %v405_v6, %v389_v5  ;;  %v369_v16 = vld [vmem:[%s1442_s6 + $0x58] sm:$0xff]  ;;  %v384_v17 = vmul.f32 0.5, %v368_v13  ;;  %v400_v18 = vld [vmem:[%s1428_s23 + $0x50] sm:$0xff]  ;;  %v418_v19 = vadd.f32 %v402_v11, %v386_v9  ;;  %v366_v23 = vld [vmem:[%s1442_s6 + $0x40] sm:$0xff] }
  0x6a   : > { %v419_v20 = vadd.f32 %v403_v12, %v387_v10  ;;  %v385_v21 = vmul.f32 0.5, %v369_v16  ;;  %v401_v22 = vld [vmem:[%s1428_s23 + $0x58] sm:$0xff]  ;;  %v367_v24 = vld [vmem:[%s1442_s6 + $0x48] sm:$0xff]  ;;  %v382_v26 = vmul.f32 0.5, %v366_v23  ;;  %v364_v27 = vld [vmem:[%s1442_s6 + $0x30] sm:$0xff] }
  0x6b   : > { %436 = vst [vmem:[%s1451_s13 + $0x70] sm:$0xff] %v420_v14  ;;  %v455_v25 = vpack.c.bf16 %v421_v15, %v420_v14  ;;  %v365_v28 = vld [vmem:[%s1442_s6 + $0x38] sm:$0xff]  ;;  %v416_v29 = vadd.f32 %v400_v18, %v384_v17  ;;  %v383_v30 = vmul.f32 0.5, %v367_v24  ;;  %v398_v31 = vld [vmem:[%s1428_s23 + $0x40] sm:$0xff]  ;;  %v399_v35 = vld [vmem:[%s1428_s23 + $0x48] sm:$0xff]  ;;  %v380_v36 = vmul.f32 0.5, %v364_v27 }
  0x6c   : > { %437 = vst [vmem:[%s1451_s13 + $0x78] sm:$0xff] %v421_v15  ;;  %v362_v32 = vld [vmem:[%s1442_s6 + $0x20] sm:$0xff]  ;;  %v454_v33 = vpack.c.bf16 %v419_v20, %v418_v19  ;;  %v417_v34 = vadd.f32 %v401_v22, %v385_v21  ;;  %v363_v37 = vld [vmem:[%s1442_s6 + $0x28] sm:$0xff]  ;;  %v381_v38 = vmul.f32 0.5, %v365_v28  ;;  %v396_v39 = vld [vmem:[%s1428_s23 + $0x30] sm:$0xff]  ;;  %v414_v41 = vadd.f32 %v398_v31, %v382_v26  ;;  %p735_p7 = scmp.ne.s32.totalorder %s1667_s9, 1 }
  0x6d   : > { %456 = vmatpush.bf16.msra.mxu0 %v455_v25  ;;  %747 = vmatpush.bf16.msra.mxu1 %v455_v25  ;;  %434 = vst [vmem:[%s1451_s13 + $0x60] sm:$0xff] %v418_v19  ;;  %v360_v40 = vld [vmem:[%s1442_s6 + $0x10] sm:$0xff]  ;;  %v397_v42 = vld [vmem:[%s1428_s23 + $0x38] sm:$0xff]  ;;  %v378_v43 = vmul.f32 0.5, %v362_v32  ;;  %v415_v45 = vadd.f32 %v399_v35, %v383_v30  ;;  %v379_v46 = vmul.f32 0.5, %v363_v37  ;;  %v394_v47 = vld [vmem:[%s1428_s23 + $0x20] sm:$0xff]  ;;  %v412_v50 = vadd.f32 %v396_v39, %v380_v36 }
  0x6e   : > { %435 = vst [vmem:[%s1451_s13 + $0x68] sm:$0xff] %v419_v20  ;;  %v361_v44 = vld [vmem:[%s1442_s6 + $0x18] sm:$0xff]  ;;  %v358_v48 = vld [vmem:[%s1442_s6] sm:$0xff]  ;;  %v453_v49 = vpack.c.bf16 %v417_v34, %v416_v29  ;;  %v395_v51 = vld [vmem:[%s1428_s23 + $0x28] sm:$0xff]  ;;  %v376_v52 = vmul.f32 0.5, %v360_v40  ;;  %v413_v54 = vadd.f32 %v397_v42, %v381_v38 }
  0x6f   : > { %432 = vst [vmem:[%s1451_s13 + $0x50] sm:$0xff] %v416_v29  ;;  %v359_v53 = vld [vmem:[%s1442_s6 + $0x8] sm:$0xff]  ;;  %v377_v55 = vmul.f32 0.5, %v361_v44  ;;  %v392_v56 = vld [vmem:[%s1428_s23 + $0x10] sm:$0xff]  ;;  %v410_v57 = vadd.f32 %v394_v47, %v378_v43  ;;  %v393_v58 = vld [vmem:[%s1428_s23 + $0x18] sm:$0xff]  ;;  %v374_v59 = vmul.f32 0.5, %v358_v48  ;;  %v411_v60 = vadd.f32 %v395_v51, %v379_v46 }
  0x70   : > { %433 = vst [vmem:[%s1451_s13 + $0x58] sm:$0xff] %v417_v34  ;;  %v375_v61 = vmul.f32 0.5, %v359_v53  ;;  %v390_v62 = vld [vmem:[%s1428_s23] sm:$0xff]  ;;  %v452_v63 = vpack.c.bf16 %v415_v45, %v414_v41  ;;  %v408_v0 = vadd.f32 %v392_v56, %v376_v52  ;;  %v391_v1 = vld [vmem:[%s1428_s23 + $0x8] sm:$0xff]  ;;  %v451_v5 = vpack.c.bf16 %v413_v54, %v412_v50  ;;  %v444_v11 = vld [vmem:[%s1436_s25 + $0x10] sm:$0xff] }
  0x71   : > { %457 = vmatpush.bf16.msra.mxu0 %v454_v33  ;;  %748 = vmatpush.bf16.msra.mxu1 %v454_v33  ;;  %430 = vst [vmem:[%s1451_s13 + $0x40] sm:$0xff] %v414_v41  ;;  %v409_v2 = vadd.f32 %v393_v58, %v377_v55  ;;  %v406_v3 = vadd.f32 %v390_v62, %v374_v59  ;;  %v442_v8 = vld [vmem:[%s1436_s25] sm:$0xff]  ;;  %v443_v10 = vld [vmem:[%s1436_s25 + $0x8] sm:$0xff]  ;;  %v445_v12 = vld [vmem:[%s1436_s25 + $0x18] sm:$0xff] }
  0x72   : > { %431 = vst [vmem:[%s1451_s13 + $0x48] sm:$0xff] %v415_v45  ;;  %v407_v4 = vadd.f32 %v391_v1, %v375_v61  ;;  %v450_v6 = vpack.c.bf16 %v411_v60, %v410_v57  ;;  %v446_v13 = vpack.c.bf16 %v443_v10, %v442_v8  ;;  %v447_v14 = vpack.c.bf16 %v445_v12, %v444_v11  ;;  %v438_v15 = vld [vmem:[#allocation2 + $0x10] sm:$0xff]  ;;  %v440_v16 = vld [vmem:[#allocation2 + $0x18] sm:$0xff]  ;;  %v439_v21 = vld [vmem:[#allocation2] sm:$0xff] }
  0x73   : > { %428 = vst [vmem:[%s1451_s13 + $0x30] sm:$0xff] %v412_v50  ;;  %v449_v7 = vpack.c.bf16 %v409_v2, %v408_v0  ;;  %v441_v22 = vld [vmem:[#allocation2 + $0x8] sm:$0xff] }
  0x74   : > { %429 = vst [vmem:[%s1451_s13 + $0x38] sm:$0xff] %v413_v54  ;;  %v448_v9 = vpack.c.bf16 %v407_v4, %v406_v3 }
  0x75   : > { %458 = vmatpush.bf16.msra.mxu0 %v453_v49  ;;  %749 = vmatpush.bf16.msra.mxu1 %v453_v49  ;;  %426 = vst [vmem:[%s1451_s13 + $0x20] sm:$0xff] %v410_v57 }
  0x76   : > { %427 = vst [vmem:[%s1451_s13 + $0x28] sm:$0xff] %v411_v60 }
  0x77   : > { %424 = vst [vmem:[%s1451_s13 + $0x10] sm:$0xff] %v408_v0 }
  0x78   : > { %425 = vst [vmem:[%s1451_s13 + $0x18] sm:$0xff] %v409_v2 }
  0x79   : > { %459 = vmatpush.bf16.msra.mxu0 %v452_v63  ;;  %750 = vmatpush.bf16.msra.mxu1 %v452_v63  ;;  %422 = vst [vmem:[%s1451_s13] sm:$0xff] %v406_v3 }
  0x7a   : > { %423 = vst [vmem:[%s1451_s13 + $0x8] sm:$0xff] %v407_v4 }
  0x7d   : > { %460 = vmatpush.bf16.msra.mxu0 %v451_v5  ;;  %751 = vmatpush.bf16.msra.mxu1 %v451_v5 }
  0x81   : > { %461 = vmatpush.bf16.msra.mxu0 %v450_v6  ;;  %752 = vmatpush.bf16.msra.mxu1 %v450_v6 }
  0x85   : > { %462 = vmatpush.bf16.msra.mxu0 %v449_v7  ;;  %753 = vmatpush.bf16.msra.mxu1 %v449_v7 }
  0x89   : > { %463 = vmatpush.bf16.msra.mxu0 %v448_v9  ;;  %754 = vmatpush.bf16.msra.mxu1 %v448_v9 }
  0x8c   : > { %464 = vmatmul.bf16.vlgmr.msra.gmra.mxu0 %v446_v13  ;;  %469 = vmatmul.bf16.vlgmr.msra.gmra.mxu1 %v447_v14 }
 0x109   : > { %v465_v17 = vpop.f32.mrf.mxu0  ;;  %v470_v18 = vpop.f32.mrf.mxu1 }
 0x10a   : > { %v475_v19 = vadd.f32 %v465_v17, %v438_v15  ;;  %v477_v20 = vadd.f32 %v470_v18, %v440_v16 }
 0x10c   : > { %479 = vst [vmem:[#allocation2 + $0x10] sm:$0xff] %v475_v19 }
 0x10d   : > { %481 = vst [vmem:[#allocation2 + $0x18] sm:$0xff] %v477_v20 }
 0x111   : > { %v467_v23 = vpop.f32.mrf.mxu0  ;;  %v472_v24 = vpop.f32.mrf.mxu1  ;;  %486 = sbr.rel (%p735_p7) target bundleno = 288 (0x120), region = 52 }
 0x112   : > { %v476_v25 = vadd.f32 %v467_v23, %v439_v21  ;;  %v478_v26 = vadd.f32 %v472_v24, %v441_v22 }
 0x114   : > { %480 = vst [vmem:[#allocation2] sm:$0xff] %v476_v25 }
 0x115   : > { %482 = vst [vmem:[#allocation2 + $0x8] sm:$0xff] %v478_v26 }
 0x116   : > { %v487_v27 = vld [vmem:[#allocation2 + $0x10] sm:$0xff]  ;;  %v489_v29 = vld [vmem:[#allocation2 + $0x18] sm:$0xff] }
 0x117   : > { %v491_v30 = vmul.f32 0.5, %v487_v27  ;;  %v493_v32 = vmul.f32 0.5, %v489_v29 }
 0x119   : > { %495 = vst [vmem:[%s1453_s3] sm:$0xff] %v491_v30 }
 0x11a   : > { %497 = vst [vmem:[%s1453_s3 + $0x10] sm:$0xff] %v493_v32 }
 0x11b   : > { %v488_v28 = vld [vmem:[#allocation2] sm:$0xff] }
 0x11c   : > { %v492_v31 = vmul.f32 0.5, %v488_v28  ;;  %v490_v33 = vld [vmem:[#allocation2 + $0x8] sm:$0xff] }
 0x11d   : > { %v494_v34 = vmul.f32 0.5, %v490_v33 }
 0x11e   : > { %496 = vst [vmem:[%s1453_s3 + $0x8] sm:$0xff] %v492_v31 }
 0x11f   : > { %498 = vst [vmem:[%s1453_s3 + $0x18] sm:$0xff] %v494_v34 }
 0x120 PF: > { %s1668_s24 = sld [smem:[#allocation22_spill]]  ;;  %s519_s18 = sshll.u32 %s1451_s13, 4  ;;  %s520_s18 = int_to_ptr.vmem [resolvable:$true] %s519_s18 }
 0x121   : > { %s1669_s7 = sld [smem:[#allocation23_spill]]  ;;  %s500_s21 = scalar_lea.sflag [#allocation5], %s1424_s1 }
 0x122   : > { %s1670_s20 = sld [smem:[#allocation35_spill]]  ;;  %p1672_p6 = scmp.ne.s32.totalorder %s1653_s5, 0 }
 0x126   : > { %s746_s14 = sshll.u32 %s1668_s24, 5 }
 0x127   : > { %s516_s11 = sadd.s32 %s1669_s7, %s746_s14 }
 0x128   : > { %s740_s30 = sshll.u32 %s516_s11, 3  ;;  %s1671_s4 = smov %s1670_s20 }
 0x129   : > { %s518_s17 = scalar_lea.hbm %s1670_s20, %s740_s30  ;;  %s1013_s8 = scalar_lea.hbm %s1671_s4, 512 }
 0x12a   : > { %s521_s23 = sshll.u32 %s518_s17, 4  ;;  %s522_s23 = int_to_ptr.hbm [resolvable:$true] %s521_s23 }
 0x12b   : > { %s1007_s26 = sshra.s32 %s522_s23, 4  ;;  %s1008_s26 = int_to_ptr.hbm [resolvable:$true] %s1007_s26 }
 0x12c   : > { %s1009_s27 = scalar_lea.hbm %s1008_s26, 128  ;;  %p1014_p2 = scmp.lt.s32.totalorder %s1008_s26, %s1671_s4 }
 0x12d   : > { %p1010_p5 = scmp.ne.s32.totalorder %s1008_s26, %s1009_s27  ;;  %p1015_p11 = scmp.lt.s32.totalorder %s1013_s8, %s1009_s27 }
 0x12f   : > { %p1011_p9 = pnand %p1010_p5, %p1672_p6  ;;  %p1016_p4 = por %p1015_p11, %p1014_p2 }
 0x131   : > { %p1012_p10 = pneg %p1011_p9 }
 0x133   : > { %p1017_p3 = pnand %p1016_p4, %p1012_p10 }
 0x135   : > { %1020 = shalt.err (!%p1017_p3)
}
 0x136   : > { %s1185_s1 = smov 128   ;;  %s1186_s24 = smov 256  }
 0x137   : > { %s1187_s14 = smov 8   ;;  %s741_s11 = sshll.u32 %s1669_s7, 3 }
 0x138   : > { %761 = dma.vmem_to_hbm [thread:$0]  (%p1672_p6), %s520_s18, 2048, %s522_s23, %s500_s21, %s1185_s1, %s1186_s24, %s1187_s14  }
 0x139   : > { %s1674_s15 = sld [smem:[#allocation36_spill]]  ;;  %s538_s17 = sshll.u32 %s1453_s3, 4  ;;  %s539_s17 = int_to_ptr.vmem [resolvable:$true] %s538_s17 }
 0x13a   : > { %s505_s27 = scalar_lea.sflag [#allocation11], %s342_s29 }
 0x13f   : > { %s1675_s6 = smov %s1674_s15  ;;  %s537_s20 = scalar_lea.hbm %s1674_s15, %s741_s11 }
 0x140   : > { %s540_s26 = sshll.u32 %s537_s20, 4  ;;  %s1041_s7 = scalar_lea.hbm %s1675_s6, 64  ;;  %s541_s26 = int_to_ptr.hbm [resolvable:$true] %s540_s26 }
 0x141   : > { %s1035_s25 = sshra.s32 %s541_s26, 4  ;;  %s1036_s25 = int_to_ptr.hbm [resolvable:$true] %s1035_s25 }
 0x142   : > { %s1037_s8 = scalar_lea.hbm %s1036_s25, 32  ;;  %p1042_p5 = scmp.lt.s32.totalorder %s1036_s25, %s1675_s6 }
 0x143   : > { %p1038_p8 = scmp.ne.s32.totalorder %s1036_s25, %s1037_s8  ;;  %p1043_p6 = scmp.lt.s32.totalorder %s1041_s7, %s1037_s8 }
 0x145   : > { %p1039_p12 = pnand %p1038_p8, %p1393_p13  ;;  %p1044_p9 = por %p1043_p6, %p1042_p5 }
 0x147   : > { %p1040_p7 = pneg %p1039_p12 }
 0x149   : > { %p1045_p10 = pnand %p1044_p9, %p1040_p7 }
 0x14b   : > { %1048 = shalt.err (!%p1045_p10)
}
 0x14c   : > { %762 = dma.vmem_to_hbm [thread:$0]  (%p1393_p13), %s539_s17, 512, %s541_s26, %s505_s27, %s1185_s1, %s1186_s24, %s1187_s14  }
 0x14d PF: > { %s1676_s29 = sld [smem:[#allocation20_spill]]  ;;  %p783_p2 = scmp.ge.s32.totalorder %s1179_s28, 2 }
 0x14f   : > { %p776_p11 = pnand %p783_p2, %p1377_p1 }
 0x151   : > { %p777_p4 = pneg %p776_p11 }
 0x153   : > { %s555_s13 = sand.u32 1, %s1676_s29  }
 0x154   : > { %s556_s12 = scalar_lea.sflag [#allocation5], %s555_s13 }
 0x155   : > { %1118 = dma.done.wait (%p777_p4), %s556_s12, 2048  }
 0x156   : > { %1120 = vsyncadd (%p777_p4), %s556_s12, 4294965248  ;;  %s1678_s11 = sld [smem:[#allocation17_spill]]  ;;  %p779_p3 = pnand %p783_p2, %p1397_p0 }
 0x158   : > { %p780_p8 = pneg %p779_p3 }
 0x15c   : > { %s565_s10 = sand.u32 1, %s1678_s11  }
 0x15d   : > { %s566_s9 = scalar_lea.sflag [#allocation11], %s565_s10 }
 0x15e   : > { %1122 = dma.done.wait (%p780_p8), %s566_s9, 512  }
 0x15f   : > { %1124 = vsyncadd (%p780_p8), %s566_s9, 4294966784  ;;  %s27_s28 = sadd.s32 1, %s1179_s28   ;;  %s1681_s24 = sld [smem:[#allocation18_spill]] }
 0x160   : > { %p1555_p13 = scmp.ge.s32.totalorder %s27_s28, 6   ;;  %s1682_s17 = sld [smem:[#allocation31_spill]] }
 0x161   : > { %s1683_s14 = sld [smem:[#allocation19_spill]]  ;;  %s1691_s15 = smov %s1131_s16 }
 0x162   : > { %s1684_s20 = sld [smem:[#allocation27_spill]]  ;;  %s1693_s18 = smov %s1143_s19 }
 0x163   : > { %s1685_s26 = sld [smem:[#allocation21_spill]]  ;;  %s1695_s21 = smov %s1155_s22 }
 0x164   : > { %s1686_s23 = sld [smem:[#allocation30_spill]] }
 0x165   : > { %s1687_s27 = sld [smem:[#allocation24_spill]]  ;;  %s1692_s16 = smov %s1681_s24 }
 0x166   : > { %s1688_s25 = sld [smem:[#allocation25_spill]] }
 0x167   : > { %s1689_s8 = sld [smem:[#allocation26_spill]]  ;;  %s1694_s19 = smov %s1683_s14 }
 0x168   : > { %s1690_s5 = sld [smem:[#allocation28_spill]] }
 0x169   : > { %s1696_s22 = smov %s1685_s26 }
 0x16a   :  { %26 = sbr.rel (!%p1555_p13) target bundleno = 18 (0x12), region = 126 }
 0x16b   : > { %s1697_s24 = smov %s1687_s27 }
 0x16d   : > { %s1698_s26 = smov %s1689_s8 }
 0x16e   : > { %s1699_s27 = smov %s1690_s5 }
 0x16f   :  { %572 = vsyncpa [#allocation4], 1 }
 0x170   :  { %574 = vsyncpa [#allocation4 + $0x1], 1 }
 0x171   :  { %575 = vsyncpa [#allocation7], 1 }
 0x172   :  { %577 = vsyncpa [#allocation7 + $0x1], 1 }
 0x173   :  { %578 = vsyncpa [#allocation5], 1 }
 0x174   :  { %580 = vsyncpa [#allocation5 + $0x1], 1 }
 0x175   :  { %581 = vsyncpa [#allocation11], 1 }
 0x176   :  { %583 = vsyncpa [#allocation11 + $0x1], 1 }

</bundles_post_ra>
